<compile_context>
chip_gen: v7x
topology: tpu7x:2x2x1
jax: 0.10.0
libtpu: 0.0.40
codegen_flags: <defaults>
</compile_context>

<pallas_src>
import jax
import jax.numpy as jnp
from jax.experimental import pallas as pl
from jax.experimental.pallas import tpu as pltpu

IN_FEATURES = 28 * 28   # 784
HIDDEN = 128
OUT_FEATURES = 10
OUT_PAD = 128           # lane-dense padded fc2 width
MAX_TB = 2048           # safe per-step tile on v5e/v6e/v7x default VMEM limits


def _mlp_kernel(x_ref, w1_ref, b1_ref, w2_ref, b2_ref, o_ref):
    # x_ref:  (TB, 784)  f32  (cast to bf16 here, hidden under the input DMA)
    # w1_ref: (784, 128) bf16      b1_ref: (1, 128) f32
    # w2_ref: (128, 128) bf16 (cols 10..127 zero)   b2_ref: (1, 128) f32
    # o_ref:  (TB, 128)  bf16
    x = x_ref[...].astype(jnp.bfloat16)
    h = jnp.dot(x, w1_ref[...], preferred_element_type=jnp.float32)
    h = jnp.maximum(h + b1_ref[...], 0.0)                 # bias + ReLU in f32
    out = jnp.dot(h.astype(jnp.bfloat16), w2_ref[...],
                  preferred_element_type=jnp.float32)
    o_ref[...] = (out + b2_ref[...]).astype(o_ref.dtype)


def _round_up(n, m):
    return (n + m - 1) // m * m


def _cdiv(a, b):
    return -(-a // b)


def _choose_tiling(B, tb):
    """Pick (TB, num_tiles) minimizing pad waste; prefer >=2 tiles for megacore."""
    tb = min(tb, MAX_TB)
    nt = max(1, _cdiv(B, tb))
    if nt == 1 and B >= 32:          # give v7x's 2nd TensorCore something to do
        nt = 2
    TB = _round_up(_cdiv(B, nt), 16)  # 16: bf16 sublane-pack friendly
    return TB, nt


def prepare_params(w1, b1, w2, b2):
    """One-time weight prep: bf16 weights, fc2/bias zero-padded to 128 lanes."""
    w1_b = w1.astype(jnp.bfloat16)                                   # (784, 128)
    b1_f = b1.reshape(1, HIDDEN).astype(jnp.float32)                 # (1, 128)
    w2_p = jnp.zeros((HIDDEN, OUT_PAD), jnp.bfloat16).at[:, :OUT_FEATURES].set(
        w2.astype(jnp.bfloat16))                                     # (128, 128)
    b2_p = jnp.zeros((1, OUT_PAD), jnp.float32).at[:, :OUT_FEATURES].set(
        b2.reshape(1, OUT_FEATURES).astype(jnp.float32))             # (1, 128)
    return w1_b, b1_f, w2_p, b2_p


def mnist_forward(x_nchw, prepared_params, *, tb=1024):
    """Forward pass matching MNISTModel: flatten -> fc1 -> relu -> fc2."""
    w1_b, b1_f, w2_p, b2_p = prepared_params
    B = x_nchw.shape[0]

    # nn.Flatten(): (B, 1, 28, 28) -> (B, 784); kept in f32 (cast happens in-kernel).
    x2d = x_nchw.reshape(B, IN_FEATURES)

    TB, nt = _choose_tiling(B, tb)
    B_pad = TB * nt
    if B_pad != B:
        x2d = jnp.pad(x2d, ((0, B_pad - B), (0, 0)))

    grid = (nt,)
    flops = 2 * B_pad * IN_FEATURES * HIDDEN + 2 * B_pad * HIDDEN * OUT_PAD
    bytes_accessed = (B_pad * IN_FEATURES * 4           # x read, f32
                      + w1_b.size * 2 + w2_p.size * 2   # weights, bf16
                      + b1_f.size * 4 + b2_p.size * 4   # biases, f32
                      + B_pad * OUT_PAD * 2)            # output write, bf16

    out = pl.pallas_call(
        _mlp_kernel,
        out_shape=jax.ShapeDtypeStruct((B_pad, OUT_PAD), jnp.bfloat16),
        grid=grid,
        in_specs=[
            pl.BlockSpec((TB, IN_FEATURES), lambda i: (i, 0)),      # x tile streams
            pl.BlockSpec((IN_FEATURES, HIDDEN), lambda i: (0, 0)),  # w1 resident
            pl.BlockSpec((1, HIDDEN), lambda i: (0, 0)),            # b1 resident
            pl.BlockSpec((HIDDEN, OUT_PAD), lambda i: (0, 0)),      # w2 resident
            pl.BlockSpec((1, OUT_PAD), lambda i: (0, 0)),           # b2 resident
        ],
        out_specs=pl.BlockSpec((TB, OUT_PAD), lambda i: (i, 0)),
        compiler_params=pltpu.CompilerParams(
            dimension_semantics=("parallel",)),
        cost_estimate=pl.CostEstimate(
            flops=flops, transcendentals=0, bytes_accessed=bytes_accessed),
    )(x2d, w1_b, b1_f, w2_p, b2_p)

    # Un-pad batch, slice back to the 10 logical classes, return f32 logits.
    return out[:B, :OUT_FEATURES].astype(jnp.float32)


def init_params(key):
    """Deterministic init matching nn.Linear shapes (Kaiming-uniform-like)."""
    k1, k2, k3, k4 = jax.random.split(key, 4)
    bound1 = 1.0 / jnp.sqrt(IN_FEATURES)
    bound2 = 1.0 / jnp.sqrt(HIDDEN)
    # Stored transposed relative to PyTorch (out,in) -> (in,out) for x @ W.
    w1 = jax.random.uniform(k1, (IN_FEATURES, HIDDEN), jnp.float32, -bound1, bound1)
    b1 = jax.random.uniform(k2, (HIDDEN,), jnp.float32, -bound1, bound1)
    w2 = jax.random.uniform(k3, (HIDDEN, OUT_FEATURES), jnp.float32, -bound2, bound2)
    b2 = jax.random.uniform(k4, (OUT_FEATURES,), jnp.float32, -bound2, bound2)
    return w1, b1, w2, b2


def reference_forward(x_nchw, w1, b1, w2, b2):
    """Pure-JAX reference using the same bf16-matmul / f32-accumulate path."""
    x2d = x_nchw.reshape(x_nchw.shape[0], IN_FEATURES).astype(jnp.bfloat16)
    h = jnp.dot(x2d, w1.astype(jnp.bfloat16), preferred_element_type=jnp.float32)
    h = jnp.maximum(h + b1.reshape(1, -1), 0.0)
    out = jnp.dot(h.astype(jnp.bfloat16), w2.astype(jnp.bfloat16),
                  preferred_element_type=jnp.float32)
    out = out + b2.reshape(1, -1)
    # Kernel stores logits as bf16; round-trip to match its output precision.
    return out.astype(jnp.bfloat16).astype(jnp.float32)


if __name__ == "__main__":
    key = jax.random.PRNGKey(0)
    kx, kp = jax.random.split(key)

    B = 2  # small batch; MNIST images are (1, 28, 28)
    x = jax.random.normal(kx, (B, 1, 28, 28), jnp.float32)
    w1, b1, w2, b2 = init_params(kp)

    prepared = prepare_params(w1, b1, w2, b2)   # one-time weight prep
    fwd = jax.jit(mnist_forward)

    out = fwd(x, prepared)
    out = jax.block_until_ready(out)

    ref = reference_forward(x, w1, b1, w2, b2)
    assert out.shape == (B, OUT_FEATURES)
    assert jnp.allclose(out, ref, atol=2e-2, rtol=2e-2), "mismatch vs reference"

    print("KERNEL_OK")
</pallas_src>

<mosaic_0001>
module attributes {stable_mosaic.version = 11 : i64} {
  func.func @_mlp_kernel(%arg0: i32, %arg1: memref<16x784xf32, #tpu.memory_space<vmem>>, %arg2: memref<784x128xbf16, #tpu.memory_space<vmem>>, %arg3: memref<1x128xf32, #tpu.memory_space<vmem>>, %arg4: memref<128x128xbf16, #tpu.memory_space<vmem>>, %arg5: memref<1x128xf32, #tpu.memory_space<vmem>>, %arg6: memref<16x128xbf16, #tpu.memory_space<vmem>>) attributes {dimension_semantics = [#tpu.dimension_semantics<parallel>], iteration_bounds = array<i64: 1>, scalar_prefetch = 0 : i64, scratch_operands = 0 : i64, tpu.core_type = #tpu.core_type<tc>, window_params = [{transform_indices = @transform_0, window_bounds = array<i64: 16, 784>}, {pipeline_mode = #tpu.pipeline_mode<synchronous>, transform_indices = @transform_1, window_bounds = array<i64: 784, 128>}, {pipeline_mode = #tpu.pipeline_mode<synchronous>, transform_indices = @transform_2, window_bounds = array<i64: 1, 128>}, {pipeline_mode = #tpu.pipeline_mode<synchronous>, transform_indices = @transform_3, window_bounds = array<i64: 128, 128>}, {pipeline_mode = #tpu.pipeline_mode<synchronous>, transform_indices = @transform_4, window_bounds = array<i64: 1, 128>}, {transform_indices = @transform_5, window_bounds = array<i64: 16, 128>}]} {
    %c0 = arith.constant 0 : index
    %c0_0 = arith.constant 0 : index
    %0 = vector.load %arg1[%c0, %c0_0] : memref<16x784xf32, #tpu.memory_space<vmem>>, vector<16x784xf32>
    %1 = arith.truncf %0 : vector<16x784xf32> to vector<16x784xbf16>
    %c0_1 = arith.constant 0 : index
    %c0_2 = arith.constant 0 : index
    %2 = vector.load %arg2[%c0_1, %c0_2] : memref<784x128xbf16, #tpu.memory_space<vmem>>, vector<784x128xbf16>
    %cst = arith.constant dense<0.000000e+00> : vector<16x128xf32>
    %3 = tpu.matmul %1, %2, %cst {dimension_numbers = #tpu.dot_dimension_numbers<[1], [0], [0], [1], [0, 0, 1, 1], [], []>} : vector<16x784xbf16>, vector<784x128xbf16>, vector<16x128xf32> -> vector<16x128xf32>
    %c0_3 = arith.constant 0 : index
    %c0_4 = arith.constant 0 : index
    %4 = vector.load %arg3[%c0_3, %c0_4] : memref<1x128xf32, #tpu.memory_space<vmem>>, vector<1x128xf32>
    %5 = vector.broadcast %4 : vector<1x128xf32> to vector<16x128xf32>
    %6 = arith.addf %3, %5 : vector<16x128xf32>
    %cst_5 = arith.constant 0.000000e+00 : f32
    %7 = vector.broadcast %cst_5 : f32 to vector<16x128xf32>
    %8 = arith.maximumf %6, %7 : vector<16x128xf32>
    %9 = arith.truncf %8 : vector<16x128xf32> to vector<16x128xbf16>
    %c0_6 = arith.constant 0 : index
    %c0_7 = arith.constant 0 : index
    %10 = vector.load %arg4[%c0_6, %c0_7] : memref<128x128xbf16, #tpu.memory_space<vmem>>, vector<128x128xbf16>
    %cst_8 = arith.constant dense<0.000000e+00> : vector<16x128xf32>
    %11 = tpu.matmul %9, %10, %cst_8 {dimension_numbers = #tpu.dot_dimension_numbers<[1], [0], [0], [1], [0, 0, 1, 1], [], []>} : vector<16x128xbf16>, vector<128x128xbf16>, vector<16x128xf32> -> vector<16x128xf32>
    %c0_9 = arith.constant 0 : index
    %c0_10 = arith.constant 0 : index
    %12 = vector.load %arg5[%c0_9, %c0_10] : memref<1x128xf32, #tpu.memory_space<vmem>>, vector<1x128xf32>
    %13 = vector.broadcast %12 : vector<1x128xf32> to vector<16x128xf32>
    %14 = arith.addf %11, %13 : vector<16x128xf32>
    %15 = arith.truncf %14 : vector<16x128xf32> to vector<16x128xbf16>
    %c0_11 = arith.constant 0 : index
    %c0_12 = arith.constant 0 : index
    %16 = vector.load %arg6[%c0_11, %c0_12] : memref<16x128xbf16, #tpu.memory_space<vmem>>, vector<16x128xbf16>
    tpu.vector_store %arg6[%c0_11, %c0_12], %15 {strides = array<i32>} : memref<16x128xbf16, #tpu.memory_space<vmem>>, vector<16x128xbf16>,
    return
  }
  func.func @transform_0(%arg0: i32) -> (i32, i32) {
    %c0_i32 = arith.constant 0 : i32
    %c0_i32_0 = arith.constant 0 : i32
    return %arg0, %c0_i32 : i32, i32
  }
  func.func @transform_1(%arg0: i32) -> (i32, i32) {
    %c0_i32 = arith.constant 0 : i32
    %c0_i32_0 = arith.constant 0 : i32
    %c0_i32_1 = arith.constant 0 : i32
    return %c0_i32, %c0_i32_0 : i32, i32
  }
  func.func @transform_2(%arg0: i32) -> (i32, i32) {
    %c0_i32 = arith.constant 0 : i32
    %c0_i32_0 = arith.constant 0 : i32
    %c0_i32_1 = arith.constant 0 : i32
    return %c0_i32, %c0_i32_0 : i32, i32
  }
  func.func @transform_3(%arg0: i32) -> (i32, i32) {
    %c0_i32 = arith.constant 0 : i32
    %c0_i32_0 = arith.constant 0 : i32
    %c0_i32_1 = arith.constant 0 : i32
    return %c0_i32, %c0_i32_0 : i32, i32
  }
  func.func @transform_4(%arg0: i32) -> (i32, i32) {
    %c0_i32 = arith.constant 0 : i32
    %c0_i32_0 = arith.constant 0 : i32
    %c0_i32_1 = arith.constant 0 : i32
    return %c0_i32, %c0_i32_0 : i32, i32
  }
  func.func @transform_5(%arg0: i32) -> (i32, i32) {
    %c0_i32 = arith.constant 0 : i32
    %c0_i32_0 = arith.constant 0 : i32
    return %arg0, %c0_i32 : i32, i32
  }
}

</mosaic_0001>

<bundles_post_ra>
// kernel: mnist_forward.1
= control target key start
LH: loop header
LB: loop body
LE: loop exit
PB: predicated region body
PF: predicated region fallthrough
CT: control target
= control target key end

     0   :  { %10 = vsyncpa [#allocation3], 0  ;;  %s1011_s18 = smov [#allocation2]   ;;  %s1146_s0 = inlined_call_operand.vmem [shape: f32[16,784], index: 0, kind: input, shape index: {}]   ;;  %s1147_s1 = inlined_call_operand.hbm [shape: bf16[784,128], index: 1, kind: input, shape index: {}]   ;;  %s1148_s2 = inlined_call_operand.vmem [shape: f32[1,128], index: 2, kind: input, shape index: {}]   ;;  %s1149_s3 = inlined_call_operand.vmem [shape: bf16[128,128], index: 3, kind: input, shape index: {}]   ;;  %s1150_s4 = inlined_call_operand.vmem [shape: f32[1,128], index: 4, kind: input, shape index: {}]   ;;  %s1151_s5 = inlined_call_operand.vmem [shape: bf16[16,128], index: 5, kind: output, shape index: {}]  }
   0x1   :  { %s18_s19 = sshll.u32 %s1011_s18, 4  ;;  %s987_s22 = scalar_lea.hbm %s1147_s1, 6272  ;;  %s19_s19 = int_to_ptr.vmem [resolvable:$true] %s18_s19 }
   0x2   :  { %p988_p0 = scmp.ne.s32.totalorder %s1147_s1, %s987_s22  ;;  %p991_p1 = scmp.lt.u32.totalorder %s987_s22, %s1147_s1 }
   0x4   :  { %p993_p2 = pnand %p991_p1, %p988_p0 }
   0x6   :  { %996 = shalt.err (!%p993_p2)
}
   0x7   :  { %s997_s27 = scalar_lea.vmem %s19_s19, 6272  ;;  %p1002_p4 = scmp.lt.s32.totalorder %s19_s19, %s19_s19 }
   0x8   :  { %p998_p3 = scmp.ne.s32.totalorder %s19_s19, %s997_s27  ;;  %p1003_p5 = scmp.lt.s32.totalorder %s997_s27, %s997_s27 }
   0xa   :  { %p1004_p6 = por %p1003_p5, %p1002_p4 }
   0xc   :  { %p1005_p7 = pnand %p1004_p6, %p998_p3 }
   0xe   :  { %1008 = shalt.err (!%p1005_p7)
}
   0xf   :  { %s1012_s28 = smov 64   ;;  %s1013_s29 = smov 4  }
  0x10   :  { %24 = dma.hbm_to_vmem [thread:$0]  %s1147_s1, 6272, %s19_s19, [#allocation3], %s1012_s28, %s1012_s28, %s1013_s29  }
  0x11   :  { %1009 = dma.done.wait [#allocation3], 6272  }
  0x12   :  { %1010 = vsyncadd [#allocation3], 4294961024  ;;  %v930_v0 = vld [vmem:[#allocation2 + $0x40] sm:$0xff]   ;;  %v934_v4 = vld [vmem:[#allocation2 + $0x48] sm:$0xff]   ;;  %v1014_v43 = vmov 0.0   ;;  %vm1015_vm0 = vmmov 0  }
  0x13   :  { %v931_v1 = vld [vmem:[#allocation2] sm:$0xff]   ;;  %822 = vmatprep.subr.bf16.mxu0 %v930_v0  ;;  %v935_v5 = vld [vmem:[#allocation2 + $0x8] sm:$0xff]   ;;  %v938_v8 = vld [vmem:[#allocation2 + $0x50] sm:$0xff]   ;;  %vm455_vm1 = vcmask 130048  }
  0x14   :  { %v932_v2 = vld [vmem:[#allocation2 + $0xc0] sm:$0xff]   ;;  %823 = vmatpush3.bf16.msra.mxu0 %v931_v1  ;;  %v936_v6 = vld [vmem:[#allocation2 + $0xc8] sm:$0xff]   ;;  %v939_v9 = vld [vmem:[#allocation2 + $0x10] sm:$0xff]  }
  0x15   :  { %v933_v3 = vld [vmem:[#allocation2 + $0x80] sm:$0xff]   ;;  %844 = vmatprep.subr.bf16.mxu1 %v932_v2  ;;  %824 = vmatprep.subr.bf16.mxu0 %v934_v4  ;;  %v937_v7 = vld [vmem:[#allocation2 + $0x88] sm:$0xff]   ;;  %v940_v10 = vld [vmem:[#allocation2 + $0xd0] sm:$0xff]  }
  0x16   :  { %845 = vmatpush3.bf16.msra.mxu1 %v933_v3  ;;  %v941_v11 = vld [vmem:[#allocation2 + $0x90] sm:$0xff]   ;;  %v942_v12 = vld [vmem:[#allocation2 + $0x58] sm:$0xff]   ;;  %v946_v16 = vld [vmem:[#allocation2 + $0x60] sm:$0xff]  }
  0x17   :  { %846 = vmatprep.subr.bf16.mxu1 %v936_v6  ;;  %v943_v13 = vld [vmem:[#allocation2 + $0x18] sm:$0xff]   ;;  %v947_v17 = vld [vmem:[#allocation2 + $0x20] sm:$0xff]   ;;  %v950_v20 = vld [vmem:[#allocation2 + $0x68] sm:$0xff]  }
  0x18   :  { %825 = vmatpush3.bf16.msra.mxu0 %v935_v5  ;;  %v944_v14 = vld [vmem:[#allocation2 + $0xd8] sm:$0xff]   ;;  %v948_v18 = vld [vmem:[#allocation2 + $0xe0] sm:$0xff]   ;;  %v951_v21 = vld [vmem:[#allocation2 + $0x28] sm:$0xff]  }
  0x19   :  { %826 = vmatprep.subr.bf16.mxu0 %v938_v8  ;;  %v945_v15 = vld [vmem:[#allocation2 + $0x98] sm:$0xff]   ;;  %v949_v19 = vld [vmem:[#allocation2 + $0xa0] sm:$0xff]   ;;  %v952_v22 = vld [vmem:[#allocation2 + $0xe8] sm:$0xff]  }
  0x1a   :  { %847 = vmatpush3.bf16.msra.mxu1 %v937_v7  ;;  %v953_v23 = vld [vmem:[#allocation2 + $0xa8] sm:$0xff]   ;;  %v954_v24 = vld [vmem:[#allocation2 + $0x70] sm:$0xff]   ;;  %v958_v28 = vld [vmem:[#allocation2 + $0x78] sm:$0xff]  }
  0x1b   :  { %848 = vmatprep.subr.bf16.mxu1 %v940_v10  ;;  %v955_v25 = vld [vmem:[#allocation2 + $0x30] sm:$0xff]   ;;  %v959_v29 = vld [vmem:[#allocation2 + $0x38] sm:$0xff]   ;;  %v36_v31 = vld [vmem:[%s1146_s0 + $0x8] sm:$0xff] }
  0x1c   :  { %827 = vmatpush3.bf16.msra.mxu0 %v939_v9  ;;  %v956_v26 = vld [vmem:[#allocation2 + $0xf0] sm:$0xff]   ;;  %v960_v30 = vld [vmem:[#allocation2 + $0xf8] sm:$0xff]   ;;  %v43_v32 = vld [vmem:[%s1146_s0 + $0x40] sm:$0xff] }
  0x1d   :  { %828 = vmatprep.subr.bf16.mxu0 %v942_v12  ;;  %v957_v27 = vld [vmem:[#allocation2 + $0xb0] sm:$0xff]   ;;  %v50_v33 = vpack.c.bf16 %v43_v32, %v36_v31  ;;  %v961_v34 = vld [vmem:[#allocation2 + $0xb8] sm:$0xff]   ;;  %v35_v35 = vld [vmem:[%s1146_s0] sm:$0xff] }
  0x1e   :  { %849 = vmatpush3.bf16.msra.mxu1 %v941_v11  ;;  %v42_v36 = vld [vmem:[%s1146_s0 + $0x38] sm:$0xff]  ;;  %v962_v38 = vld [vmem:[#allocation2 + $0x140] sm:$0xff]   ;;  %v45_v40 = vld [vmem:[%s1146_s0 + $0x50] sm:$0xff] }
  0x1f   :  { %850 = vmatprep.subr.bf16.mxu1 %v944_v14  ;;  %491 = vmatprep.mubr.bf16.mxu0 %v50_v33  ;;  %v49_v37 = vpack.c.bf16 %v42_v36, %v35_v35  ;;  %v38_v39 = vld [vmem:[%s1146_s0 + $0x18] sm:$0xff]  ;;  %v963_v42 = vld [vmem:[#allocation2 + $0x100] sm:$0xff]   ;;  %v37_v44 = vld [vmem:[%s1146_s0 + $0x10] sm:$0xff] }
  0x20   :  { %829 = vmatpush3.bf16.msra.mxu0 %v943_v13  ;;  %v52_v41 = vpack.c.bf16 %v45_v40, %v38_v39  ;;  %v44_v45 = vld [vmem:[%s1146_s0 + $0x48] sm:$0xff]  ;;  %v966_v49 = vld [vmem:[#allocation2 + $0x150] sm:$0xff]   ;;  %v968_v51 = vld [vmem:[#allocation2 + $0x158] sm:$0xff]  }
  0x21   :  { %830 = vmatprep.subr.bf16.mxu0 %v946_v16  ;;  %v51_v46 = vpack.c.bf16 %v44_v45, %v37_v44  ;;  %v964_v47 = vld [vmem:[#allocation2 + $0x148] sm:$0xff]   ;;  %v967_v50 = vld [vmem:[#allocation2 + $0x110] sm:$0xff]   ;;  %v969_v52 = vld [vmem:[#allocation2 + $0x118] sm:$0xff]  }
  0x22   :  { %851 = vmatpush3.bf16.msra.mxu1 %v945_v15  ;;  %532 = vmatprep.mubr.bf16.mxu1 %v52_v41  ;;  %v965_v48 = vld [vmem:[#allocation2 + $0x108] sm:$0xff]   ;;  %v970_v53 = vld [vmem:[#allocation2 + $0x160] sm:$0xff]   ;;  %v974_v59 = vld [vmem:[#allocation2 + $0x170] sm:$0xff]  }
  0x23   :  { %852 = vmatprep.subr.bf16.mxu1 %v948_v18  ;;  %v971_v54 = vld [vmem:[#allocation2 + $0x120] sm:$0xff]   ;;  %v972_v55 = vld [vmem:[#allocation2 + $0x168] sm:$0xff]   ;;  %v41_v62 = vld [vmem:[%s1146_s0 + $0x30] sm:$0xff] }
  0x24   :  { %831 = vmatpush3.bf16.msra.mxu0 %v947_v17  ;;  %v978_v56 = vld [vmem:[#allocation2 + $0x180] sm:$0xff]   ;;  %v40_v57 = vld [vmem:[%s1146_s0 + $0x28] sm:$0xff]  ;;  %v975_v1 = vld [vmem:[#allocation2 + $0x130] sm:$0xff]  }
  0x25   :  { %832 = vmatprep.subr.bf16.mxu0 %v950_v20  ;;  %v973_v58 = vld [vmem:[#allocation2 + $0x128] sm:$0xff]   ;;  %v47_v60 = vld [vmem:[%s1146_s0 + $0x60] sm:$0xff]  ;;  %v976_v2 = vld [vmem:[#allocation2 + $0x178] sm:$0xff]  }
  0x26   :  { %853 = vmatpush3.bf16.msra.mxu1 %v949_v19  ;;  %v54_v61 = vpack.c.bf16 %v47_v60, %v40_v57  ;;  %v48_v63 = vld [vmem:[%s1146_s0 + $0x68] sm:$0xff]  ;;  %v977_v3 = vld [vmem:[#allocation2 + $0x138] sm:$0xff]   ;;  %v39_v4 = vld [vmem:[%s1146_s0 + $0x20] sm:$0xff] }
  0x27   :  { %854 = vmatprep.subr.bf16.mxu1 %v952_v22  ;;  %v55_v0 = vpack.c.bf16 %v48_v63, %v41_v62  ;;  %v46_v5 = vld [vmem:[%s1146_s0 + $0x58] sm:$0xff]  ;;  %v979_v7 = vld [vmem:[%s1149_s3] sm:$0xff]   ;;  %v980_v8 = vld [vmem:[%s1149_s3 + $0x8] sm:$0xff]  }
  0x28   :  { %833 = vmatpush3.bf16.msra.mxu0 %v951_v21  ;;  %v53_v6 = vpack.c.bf16 %v46_v5, %v39_v4  ;;  %v981_v9 = vld [vmem:[%s1149_s3 + $0x10] sm:$0xff]   ;;  %v982_v10 = vld [vmem:[%s1149_s3 + $0x18] sm:$0xff]   ;;  %v983_v11 = vld [vmem:[%s1149_s3 + $0x20] sm:$0xff]  }
  0x29   :  { %834 = vmatprep.subr.bf16.mxu0 %v954_v24  ;;  %v984_v12 = vld [vmem:[%s1149_s3 + $0x28] sm:$0xff]   ;;  %v985_v13 = vld [vmem:[%s1149_s3 + $0x30] sm:$0xff]   ;;  %v986_v14 = vld [vmem:[%s1149_s3 + $0x38] sm:$0xff]  }
  0x2a   :  { %855 = vmatpush3.bf16.msra.mxu1 %v953_v23  ;;  %v753_v16 = vld [vmem:[%s1148_s2] ss:$0 sm:$0xff] }
  0x2b   :  { %856 = vmatprep.subr.bf16.mxu1 %v956_v26 }
  0x2c   :  { %835 = vmatpush3.bf16.msra.mxu0 %v955_v25 }
  0x2d   :  { %836 = vmatprep.subr.bf16.mxu0 %v958_v28 }
  0x2e   :  { %857 = vmatpush3.bf16.msra.mxu1 %v957_v27 }
  0x2f   :  { %858 = vmatprep.subr.bf16.mxu1 %v960_v30 }
  0x30   :  { %837 = vmatpush3.bf16.msra.mxu0 %v959_v29 }
  0x31   :  { %866 = vmatprep.subr.bf16.mxu0 %v962_v38 }
  0x32   :  { %859 = vmatpush3.bf16.msra.mxu1 %v961_v34 }
  0x33   :  { %899 = vmatprep.subr.bf16.mxu1 %v1014_v43  ;;  %492 = vmatmul.mubr.bf16.vlgmr.msra.gmra.mrb[0].mxu0 %v49_v37 }
  0x34   :  { %867 = vmatpush3.bf16.msra.mxu0 %v963_v42  ;;  %573 = vmatprep.mubr.bf16.mxu0 %v54_v61 }
  0x35   :  { %533 = vmatmul.mubr.bf16.vlgmr.msra.gmra.mrb[0].mxu1 %v51_v46  ;;  %868 = vmatprep.subr.bf16.mxu0 %v964_v47 }
  0x36   :  { %901 = vmatprep.mubr.msk.bf16.mxu1 %vm1015_vm0, %v1014_v43  ;;  %900 = vmatpush3.bf16.msra.mxu1 %v978_v56 }
  0x37   :  { %905 = vmatprep.subr.bf16.mxu1 %v1014_v43 }
  0x38   :  { %869 = vmatpush3.bf16.msra.mxu0 %v965_v48 }
  0x39   :  { %870 = vmatprep.subr.bf16.mxu0 %v966_v49  ;;  %v804_v49 = vld [vmem:[%s1150_s4] ss:$0 sm:$0xff] }
  0x3c   :  { %871 = vmatpush3.bf16.msra.mxu0 %v967_v50 }
  0x3d   :  { %872 = vmatprep.subr.bf16.mxu0 %v968_v51  ;;  %902 = vmatmul.mubr.msk.bf16.vlgmr.msra.gmra.mrb[4].mxu1 %vm455_vm1, %v55_v0 }
  0x3e   :  { %921 = vmatprep.mubr.msk.bf16.mxu1 %vm1015_vm0, %v1014_v43  ;;  %906 = vmatpush3.bf16.msra.mxu1 %v979_v7 }
  0x3f   :  { %907 = vmatprep.subr.bf16.mxu1 %v1014_v43 }
  0x40   :  { %873 = vmatpush3.bf16.msra.mxu0 %v969_v52 }
  0x41   :  { %874 = vmatprep.subr.bf16.mxu0 %v970_v53 }
  0x42   :  { %908 = vmatpush3.bf16.msra.mxu1 %v980_v8 }
  0x43   :  { %909 = vmatprep.subr.bf16.mxu1 %v1014_v43 }
  0x44   :  { %875 = vmatpush3.bf16.msra.mxu0 %v971_v54 }
  0x45   :  { %876 = vmatprep.subr.bf16.mxu0 %v972_v55 }
  0x46   :  { %910 = vmatpush3.bf16.msra.mxu1 %v981_v9 }
  0x47   :  { %911 = vmatprep.subr.bf16.mxu1 %v1014_v43 }
  0x48   :  { %877 = vmatpush3.bf16.msra.mxu0 %v973_v58 }
  0x49   :  { %878 = vmatprep.subr.bf16.mxu0 %v974_v59 }
  0x4a   :  { %912 = vmatpush3.bf16.msra.mxu1 %v982_v10 }
  0x4b   :  { %913 = vmatprep.subr.bf16.mxu1 %v1014_v43 }
  0x4c   :  { %879 = vmatpush3.bf16.msra.mxu0 %v975_v1 }
  0x4d   :  { %880 = vmatprep.subr.bf16.mxu0 %v976_v2 }
  0x4e   :  { %914 = vmatpush3.bf16.msra.mxu1 %v983_v11 }
  0x4f   :  { %915 = vmatprep.subr.bf16.mxu1 %v1014_v43 }
  0x50   :  { %881 = vmatpush3.bf16.msra.mxu0 %v977_v3 }
  0x52   :  { %916 = vmatpush3.bf16.msra.mxu1 %v984_v12 }
  0x53   :  { %574 = vmatmul.mubr.bf16.vlgmr.msra.gmra.mrb[4].mxu0 %v53_v6  ;;  %917 = vmatprep.subr.bf16.mxu1 %v1014_v43 }
  0x56   :  { %918 = vmatpush3.bf16.msra.mxu1 %v985_v13 }
  0x57   :  { %919 = vmatprep.subr.bf16.mxu1 %v1014_v43 }
  0x5a   :  { %920 = vmatpush3.bf16.msra.mxu1 %v986_v14 }
 0x106   :  { %v838_v15 = vpop.f32.mrb[0].mxu0 }
 0x107   :  { %v839_v17 = vpop.f32.mrb[1].mxu0 }
 0x108   :  { %v840_v18 = vadd.f32 %v839_v17, %v838_v15  ;;  %v841_v19 = vpop.f32.mrb[2].mxu0  ;;  %v860_v20 = vpop.f32.mrb[0].mxu1 }
 0x109   :  { %v842_v21 = vpop.f32.mrb[3].mxu0  ;;  %v861_v24 = vpop.f32.mrb[1].mxu1 }
 0x10a   :  { %v494_v22 = vadd.f32 %v840_v18, %v753_v16  ;;  %v843_v23 = vadd.f32 %v842_v21, %v841_v19  ;;  %v862_v25 = vadd.f32 %v861_v24, %v860_v20  ;;  %v863_v26 = vpop.f32.mrb[2].mxu1 }
 0x10b   :  { %v864_v28 = vpop.f32.mrb[3].mxu1 }
 0x10c   :  { %v497_v27 = vadd.f32 %v843_v23, %v753_v16  ;;  %v535_v29 = vadd.f32 %v862_v25, %v494_v22  ;;  %v865_v30 = vadd.f32 %v864_v28, %v863_v26 }
 0x10e   :  { %v538_v31 = vadd.f32 %v865_v30, %v497_v27 }
 0x110   :  { %v616_v32 = vpop.f32.mrb[4].mxu1 }
 0x111   :  { %v903_v33 = vpop.f32.mrb[5].mxu1 }
 0x112   :  { %v619_v34 = vpop.f32.mrb[6].mxu1 }
 0x113   :  { %v904_v35 = vpop.f32.mrb[7].mxu1 }
 0x126   :  { %v882_v36 = vpop.f32.mrb[4].mxu0 }
 0x127   :  { %v883_v37 = vpop.f32.mrb[5].mxu0 }
 0x128   :  { %v884_v38 = vadd.f32 %v883_v37, %v882_v36  ;;  %v885_v39 = vpop.f32.mrb[6].mxu0 }
 0x129   :  { %v886_v40 = vpop.f32.mrb[7].mxu0 }
 0x12a   :  { %v576_v41 = vadd.f32 %v884_v38, %v535_v29  ;;  %v887_v42 = vadd.f32 %v886_v40, %v885_v39 }
 0x12c   :  { %v617_v43 = vadd.f32 %v616_v32, %v576_v41  ;;  %v579_v44 = vadd.f32 %v887_v42, %v538_v31 }
 0x12e   :  { %v620_v45 = vadd.f32 %v619_v34, %v579_v44  ;;  %v623_v46 = vmax.f32 %v617_v43, 0.0 }
 0x130   :  { %v624_v47 = vmax.f32 %v620_v45, 0.0 }
 0x132   :  { %v625_v48 = vpack.c.bf16 %v624_v47, %v623_v46 }
 0x134   :  { %922 = vmatmul.mubr.bf16.vlgmr.msra.gmra.mrb[8].mxu1 %v625_v48 }
 0x207   :  { %v731_v50 = vpop.f32.mrb[8].mxu1 }
 0x208   :  { %v923_v51 = vpop.f32.mrb[9].mxu1  ;;  %v732_v53 = vadd.f32 %v804_v49, %v731_v50 }
 0x209   :  { %v734_v52 = vpop.f32.mrb[10].mxu1 }
 0x20a   :  { %v735_v54 = vadd.f32 %v804_v49, %v734_v52  ;;  %v924_v55 = vpop.f32.mrb[11].mxu1 }
 0x20c   :  { %v820_v56 = vpack.c.bf16 %v735_v54, %v732_v53 }
 0x20e   :  { %821 = vst [vmem:[%s1151_s5] sm:$0xff] %v820_v56  }
 0x20f   :  { %752 = vsyncpa [#allocation3], 1 }

</bundles_post_ra>
